<compile_context>
chip_gen: v6e
topology: v6e:2x2x1
jax: 0.10.0
libtpu: 0.0.40
codegen_flags: <defaults>
</compile_context>

<pallas_src>
import jax
import jax.numpy as jnp
from jax.experimental import pallas as pl
from jax.experimental.pallas import tpu as pltpu


def _make_nca_tile_kernel(B, N, TN):
    needs_tail_mask = (N % TN) != 0

    def kernel(x_ref, labels_ref, y_ref, idx_ref, p_ref, z_ref):
        k = pl.program_id(0)

        # Cast per tile (input may be bf16); exp runs on the EUP slot.
        x = x_ref[...].astype(jnp.float32)              # (B, TN)
        e = jnp.exp(x)
        # TODO(synk): a log-sum-exp (running row max) rewrite would be safer for
        # large similarity magnitudes, but raw exp matches the module semantics.

        # Global column index for this tile: self-column zeroing + tail masking.
        col = jax.lax.broadcasted_iota(jnp.int32, (B, TN), 1) + k * TN
        keep = col != idx_ref[...]                      # scatter_(1, indexes, 0)
        if needs_tail_mask:
            keep = jnp.logical_and(keep, col < N)       # mask padded columns
        e = jnp.where(keep, e, 0.0)

        # same-class mask: labels[indexes[i]] == labels[j]
        same = labels_ref[...] == y_ref[...]            # (1,TN) vs (B,1) -> (B,TN)

        # Per-tile partial sums -> this grid step's private output block.
        p_ref[0] = jnp.sum(jnp.where(same, e, 0.0), axis=1, keepdims=True)  # (B,1)
        z_ref[0] = jnp.sum(e, axis=1, keepdims=True)                        # (B,1)

    return kernel


def nca_cross_entropy(x, indexes, labels, *, tn=None):
    """NCA cross-entropy loss.

    x:       (B, N) similarities (any float dtype; cast per-tile in-kernel).
    indexes: (B,)   indices of the batch instances in the memory bank.
    labels:  (N,)   labels of the whole memory bank.
    """
    B, N = x.shape
    indexes = indexes.astype(jnp.int32)
    labels = labels.astype(jnp.int32)

    # Tiny glue (B-/N-element gathers and reshapes) — negligible HBM traffic.
    y = labels[indexes].reshape(B, 1)        # label of each query row
    idx = indexes.reshape(B, 1)              # self column per query row
    labels2d = labels.reshape(1, N)

    # Tile size along N: lane-dense (multiple of 128), ~2 MiB of x per tile so
    # the double-buffered inputs stay well under v7x's 64 MiB VMEM while
    # amortizing the ~0.35 us per-grid-step overhead.  Sweepable via `tn`.
    itemsize = jnp.dtype(x.dtype).itemsize
    if tn is None:
        target = (2 * 1024 * 1024) // max(B * itemsize, 1)
        tn = max(128, (target // 128) * 128)
    if tn >= N:
        tn = N                               # single full-width tile (always legal)
    else:
        tn = max(128, (tn // 128) * 128)     # lane-dense tiles

    num_tiles = pl.cdiv(N, tn)
    kernel = _make_nca_tile_kernel(B, N, tn)

    # Explicit scoped-VMEM budget: double-buffered (x + labels) tiles + slack,
    # clamped so it also fits v7x (64 MiB physical VMEM).
    tile_bytes = B * tn * itemsize + tn * 4
    vmem_limit = int(min(max(4 * tile_bytes + (4 << 20), 16 << 20), 48 << 20))

    grid_spec = pltpu.PrefetchScalarGridSpec(
        num_scalar_prefetch=0,
        grid=(num_tiles,),
        in_specs=[
            pl.BlockSpec((B, tn), lambda k: (0, k)),     # x tile
            pl.BlockSpec((1, tn), lambda k: (0, k)),     # labels tile
            pl.BlockSpec((B, 1), lambda k: (0, 0)),      # y (resident)
            pl.BlockSpec((B, 1), lambda k: (0, 0)),      # idx (resident)
        ],
        out_specs=[
            pl.BlockSpec((1, B, 1), lambda k: (k, 0, 0)),  # per-tile partial p
            pl.BlockSpec((1, B, 1), lambda k: (k, 0, 0)),  # per-tile partial Z
        ],
    )

    p_parts, z_parts = pl.pallas_call(
        kernel,
        out_shape=(jax.ShapeDtypeStruct((num_tiles, B, 1), jnp.float32),
                   jax.ShapeDtypeStruct((num_tiles, B, 1), jnp.float32)),
        grid_spec=grid_spec,
        compiler_params=pltpu.CompilerParams(
            # Grid steps are independent -> shard across TensorCores on v7x.
            dimension_semantics=("parallel",),
            vmem_limit_bytes=vmem_limit,
        ),
    )(x, labels2d, y, idx)

    # Tiny epilogue (O(num_tiles * B) elements) in plain JAX.
    p = jnp.sum(p_parts[:, :, 0], axis=0)                # (B,)
    z = jnp.sum(z_parts[:, :, 0], axis=0)                # (B,)
    prob = p / z
    valid = prob != 0.0                                  # masked_select(prob, prob.ne(0))
    logp = jnp.where(valid, jnp.log(jnp.where(valid, prob, 1.0)), 0.0)
    return -jnp.sum(logp) / jnp.float32(B)


def _reference(x, indexes, labels):
    """Pure-JAX reference mirroring the PyTorch forward."""
    B, N = x.shape
    e = jnp.exp(x.astype(jnp.float32))
    y = labels[indexes].reshape(B, 1)
    same = (y == labels.reshape(1, N))
    col = jnp.arange(N, dtype=jnp.int32).reshape(1, N)
    e = jnp.where(col == indexes.reshape(B, 1), 0.0, e)
    p = jnp.sum(e * same.astype(jnp.float32), axis=1)
    Z = jnp.sum(e, axis=1)
    prob = p / Z
    logp = jnp.where(prob != 0.0, jnp.log(prob), 0.0)
    return -jnp.sum(logp) / B


if __name__ == "__main__":
    key = jax.random.PRNGKey(0)
    k1, k2, k3 = jax.random.split(key, 3)

    B = 8            # batch of query instances
    N = 320          # dataset size; deliberately NOT a multiple of the test tile
    n_classes = 4

    # Stored label buffer of the dataset.
    labels = jax.random.randint(k1, (N,), 0, n_classes, dtype=jnp.int32)
    # Indexes of the training instances in this batch.
    indexes = jax.random.permutation(k2, N)[:B].astype(jnp.int32)
    # Similarity matrix (e.g. features @ memory_bank.T).
    x = 0.5 * jax.random.normal(k3, (B, N), dtype=jnp.float32)

    ref = _reference(x, indexes, labels)

    # Multi-tile path (tiles of 128, last one partial): exercises the per-tile
    # partial outputs, the global-column self mask and the tail mask.
    loss_tiled = jax.block_until_ready(nca_cross_entropy(x, indexes, labels, tn=128))
    assert jnp.allclose(loss_tiled, ref, rtol=1e-5, atol=1e-5), (loss_tiled, ref)

    # Default path (auto tile size -> single full-width tile at this small N).
    loss_auto = jax.block_until_ready(nca_cross_entropy(x, indexes, labels))
    assert jnp.allclose(loss_auto, ref, rtol=1e-5, atol=1e-5), (loss_auto, ref)

    print("KERNEL_OK")
</pallas_src>

<mosaic_0001>
module attributes {stable_mosaic.version = 11 : i64} {
  func.func @kernel(%arg0: i32, %arg1: memref<8x128xf32, #tpu.memory_space<vmem>>, %arg2: memref<1x128xi32, #tpu.memory_space<vmem>>, %arg3: memref<8x1xi32, #tpu.memory_space<vmem>>, %arg4: memref<8x1xi32, #tpu.memory_space<vmem>>, %arg5: memref<1x8x1xf32, #tpu.memory_space<vmem>>, %arg6: memref<1x8x1xf32, #tpu.memory_space<vmem>>) attributes {dimension_semantics = [#tpu.dimension_semantics<parallel>], iteration_bounds = array<i64: 3>, scalar_prefetch = 0 : i64, scratch_operands = 0 : i64, tpu.core_type = #tpu.core_type<tc>, window_params = [{transform_indices = @transform_0, window_bounds = array<i64: 8, 128>}, {transform_indices = @transform_1, window_bounds = array<i64: 1, 128>}, {pipeline_mode = #tpu.pipeline_mode<synchronous>, transform_indices = @transform_2, window_bounds = array<i64: 8, 1>}, {pipeline_mode = #tpu.pipeline_mode<synchronous>, transform_indices = @transform_3, window_bounds = array<i64: 8, 1>}, {transform_indices = @transform_4, window_bounds = array<i64: 1, 8, 1>}, {transform_indices = @transform_5, window_bounds = array<i64: 1, 8, 1>}]} {
    %c0 = arith.constant 0 : index
    %c0_0 = arith.constant 0 : index
    %0 = vector.load %arg1[%c0, %c0_0] : memref<8x128xf32, #tpu.memory_space<vmem>>, vector<8x128xf32>
    %1 = math.exp %0 : vector<8x128xf32>
    %2 = tpu.iota {dimensions = array<i32: 1>} : vector<8x128xi32>
    %c128_i32 = arith.constant 128 : i32
    %3 = arith.muli %arg0, %c128_i32 : i32
    %4 = vector.broadcast %3 : i32 to vector<8x128xi32>
    %5 = arith.addi %2, %4 : vector<8x128xi32>
    %c0_1 = arith.constant 0 : index
    %c0_2 = arith.constant 0 : index
    %6 = vector.load %arg4[%c0_1, %c0_2] : memref<8x1xi32, #tpu.memory_space<vmem>>, vector<8x1xi32>
    %7 = vector.broadcast %6 : vector<8x1xi32> to vector<8x128xi32>
    %8 = arith.cmpi ne, %5, %7 : vector<8x128xi32>
    %c320_i32 = arith.constant 320 : i32
    %9 = vector.broadcast %c320_i32 : i32 to vector<8x128xi32>
    %10 = arith.cmpi slt, %5, %9 : vector<8x128xi32>
    %11 = arith.andi %8, %10 : vector<8x128xi1>
    %cst = arith.constant 0.000000e+00 : f32
    %12 = vector.broadcast %cst : f32 to vector<8x128xf32>
    %13 = arith.select %11, %1, %12 : vector<8x128xi1>, vector<8x128xf32>
    %c0_3 = arith.constant 0 : index
    %c0_4 = arith.constant 0 : index
    %14 = vector.load %arg2[%c0_3, %c0_4] : memref<1x128xi32, #tpu.memory_space<vmem>>, vector<1x128xi32>
    %c0_5 = arith.constant 0 : index
    %c0_6 = arith.constant 0 : index
    %15 = vector.load %arg3[%c0_5, %c0_6] : memref<8x1xi32, #tpu.memory_space<vmem>>, vector<8x1xi32>
    %16 = vector.broadcast %14 : vector<1x128xi32> to vector<8x128xi32>
    %17 = vector.broadcast %15 : vector<8x1xi32> to vector<8x128xi32>
    %18 = arith.cmpi eq, %16, %17 : vector<8x128xi32>
    %cst_7 = arith.constant 0.000000e+00 : f32
    %19 = vector.broadcast %cst_7 : f32 to vector<8x128xf32>
    %20 = arith.select %18, %13, %19 : vector<8x128xi1>, vector<8x128xf32>
    %cst_8 = arith.constant dense<0.000000e+00> : vector<8xf32>
    %21 = vector.multi_reduction <add>, %20, %cst_8 [1] : vector<8x128xf32> to vector<8xf32>
    %22 = vector.shape_cast %21 : vector<8xf32> to vector<8x1xf32>
    %c0_9 = arith.constant 0 : index
    %c0_10 = arith.constant 0 : index
    %c0_11 = arith.constant 0 : index
    %23 = vector.load %arg5[%c0_9, %c0_10, %c0_11] : memref<1x8x1xf32, #tpu.memory_space<vmem>>, vector<1x8x1xf32>
    %24 = vector.shape_cast %23 : vector<1x8x1xf32> to vector<8x1xf32>
    %25 = vector.shape_cast %22 : vector<8x1xf32> to vector<1x8x1xf32>
    tpu.vector_store %arg5[%c0_9, %c0_10, %c0_11], %25 {strides = array<i32>} : memref<1x8x1xf32, #tpu.memory_space<vmem>>, vector<1x8x1xf32>,
    %cst_12 = arith.constant dense<0.000000e+00> : vector<8xf32>
    %26 = vector.multi_reduction <add>, %13, %cst_12 [1] : vector<8x128xf32> to vector<8xf32>
    %27 = vector.shape_cast %26 : vector<8xf32> to vector<8x1xf32>
    %c0_13 = arith.constant 0 : index
    %c0_14 = arith.constant 0 : index
    %c0_15 = arith.constant 0 : index
    %28 = vector.load %arg6[%c0_13, %c0_14, %c0_15] : memref<1x8x1xf32, #tpu.memory_space<vmem>>, vector<1x8x1xf32>
    %29 = vector.shape_cast %28 : vector<1x8x1xf32> to vector<8x1xf32>
    %30 = vector.shape_cast %27 : vector<8x1xf32> to vector<1x8x1xf32>
    tpu.vector_store %arg6[%c0_13, %c0_14, %c0_15], %30 {strides = array<i32>} : memref<1x8x1xf32, #tpu.memory_space<vmem>>, vector<1x8x1xf32>,
    return
  }
  func.func @transform_0(%arg0: i32) -> (i32, i32) {
    %c0_i32 = arith.constant 0 : i32
    %c0_i32_0 = arith.constant 0 : i32
    return %c0_i32, %arg0 : i32, i32
  }
  func.func @transform_1(%arg0: i32) -> (i32, i32) {
    %c0_i32 = arith.constant 0 : i32
    %c0_i32_0 = arith.constant 0 : i32
    return %c0_i32, %arg0 : i32, i32
  }
  func.func @transform_2(%arg0: i32) -> (i32, i32) {
    %c0_i32 = arith.constant 0 : i32
    %c0_i32_0 = arith.constant 0 : i32
    %c0_i32_1 = arith.constant 0 : i32
    return %c0_i32, %c0_i32_0 : i32, i32
  }
  func.func @transform_3(%arg0: i32) -> (i32, i32) {
    %c0_i32 = arith.constant 0 : i32
    %c0_i32_0 = arith.constant 0 : i32
    %c0_i32_1 = arith.constant 0 : i32
    return %c0_i32, %c0_i32_0 : i32, i32
  }
  func.func @transform_4(%arg0: i32) -> (i32, i32, i32) {
    %c0_i32 = arith.constant 0 : i32
    %c0_i32_0 = arith.constant 0 : i32
    %c0_i32_1 = arith.constant 0 : i32
    return %arg0, %c0_i32, %c0_i32_0 : i32, i32, i32
  }
  func.func @transform_5(%arg0: i32) -> (i32, i32, i32) {
    %c0_i32 = arith.constant 0 : i32
    %c0_i32_0 = arith.constant 0 : i32
    %c0_i32_1 = arith.constant 0 : i32
    return %arg0, %c0_i32, %c0_i32_0 : i32, i32, i32
  }
}

</mosaic_0001>

<bundles_post_ra>
// kernel: tpu_custom_call.1
= control target key start
LH: loop header
LB: loop body
LE: loop exit
PB: predicated region body
PF: predicated region fallthrough
CT: control target
= control target key end

     0   :  { %11 = vsyncpa [#allocation3], 0  ;;  %s669_s0 = inlined_call_operand.hbm [shape: f32[8,320], index: 0, kind: input, shape index: {}]   ;;  %s670_s1 = inlined_call_operand.vmem [shape: s32[1,320], index: 1, kind: input, shape index: {}]   ;;  %s671_s2 = inlined_call_operand.vmem [shape: s32[8,1], index: 2, kind: input, shape index: {}]   ;;  %s672_s3 = inlined_call_operand.vmem [shape: s32[8,1], index: 3, kind: input, shape index: {}]   ;;  %s673_s4 = inlined_call_operand.vmem [shape: f32[3,8,1], index: 4, kind: output, shape index: {0}]   ;;  %s674_s5 = inlined_call_operand.vmem [shape: f32[3,8,1], index: 5, kind: output, shape index: {1}]  }
   0x1   :  { %13 = vsyncpa [#allocation3 + $0x1], 0  ;;  %s556_s18 = smov 0   ;;  %s558_s19 = smov 0  }
   0x2   :  { %s560_s20 = smov 0   ;;  %s562_s21 = smov 0  }
   0x3 LB: > { %s575_s22 = sadd.s32 4294967295, %s522_s21   ;;  %s578_s23 = sadd.s32 1, %s522_s21   ;;  %s522_s21 = sphi %s562_s21, %s684_s21   ;;  %s518_s20 = sphi %s560_s20, %s683_s20   ;;  %s514_s19 = sphi %s558_s19, %s682_s19   ;;  %s510_s18 = sphi %s556_s18, %s681_s18  }
   0x4   : > { %s23_s24 = ssub.s32 %s522_s21, %s578_s23  ;;  %s26_s25 = sadd.s32 1, %s518_s20 }
   0x5   : > { %p24_p0 = scmp.eq.s32.totalorder %s23_s24, 0  ;;  %p33_p1 = scmp.ne.s32.totalorder %s518_s20, %s514_s19 }
   0x6   : > { %p34_p2 = scmp.eq.s32.totalorder %s522_s21, 0  ;;  %p39_p3 = scmp.ne.s32.totalorder %s514_s19, %s510_s18 }
   0x7   : > { %s588_s26 = scalar_select %p24_p0, %s518_s20, %s26_s25  }
   0x8   : > { %p35_p4 = por %p34_p2, %p33_p1  ;;  %p40_p5 = scmp.eq.s32.totalorder %s575_s22, 0 }
   0x9   : > { %p423_p6 = scmp.lt.s32.totalorder %s522_s21, 3  ;;  %s189_s28 = sand.u32 1, %s518_s20  }
   0xa   : > { %p592_p7 = por %p40_p5, %p39_p3  ;;  %s407_s29 = sshll.u32 %s189_s28, 3 }
   0xb   : > { %s408_s30 = sshll.u32 %s522_s21, 7  ;;  %s193_s9 = scalar_lea.vmem [#allocation2], %s407_s29 }
   0xc   : > { %s676_s27 = scalar_select %p592_p7, 1, 0 }
   0xd   : > { %s601_s8 = scalar_lea.hbm %s669_s0, %s408_s30  ;;  %s200_s10 = sshll.u32 %s193_s9, 4  ;;  %s603_s10 = int_to_ptr.vmem [resolvable:$true] %s200_s10 }
   0xe   : > { %p605_p8 = pnand %p423_p6, %p35_p4  ;;  %s190_s12 = scalar_lea.sflag [#allocation3], %s189_s28 }
   0xf   : > { %s460_s13 = scalar_lea.hbm %s601_s8, 128  ;;  %s465_s16 = scalar_lea.hbm %s669_s0, 384 }
  0x10   : > { %p461_p11 = scmp.ne.s32.totalorder %s601_s8, %s460_s13  ;;  %p462_p12 = pneg %p605_p8 }
  0x11   : > { %p466_p1 = scmp.lt.s32.totalorder %s601_s8, %s669_s0  ;;  %p467_p2 = scmp.lt.s32.totalorder %s465_s16, %s460_s13 }
  0x12   : > { %p463_p13 = pnand %p462_p12, %p461_p11 }
  0x13   : > { %p468_p3 = por %p467_p2, %p466_p1 }
  0x14   : > { %p464_p0 = pneg %p463_p13 }
  0x16   : > { %p469_p4 = pnand %p468_p3, %p464_p0 }
  0x18   : > { %472 = shalt.err (!%p469_p4)
}
  0x19   : > { %s473_s24 = scalar_lea.vmem %s603_s10, 128  ;;  %s524_s25 = smov [#allocation2]  }
  0x1a   : > { %p474_p5 = scmp.ne.s32.totalorder %s603_s10, %s473_s24  ;;  %s478_s28 = sshll.u32 %s524_s25, 4  ;;  %s479_s28 = int_to_ptr.vmem [resolvable:$false] %s478_s28 }
  0x1b   : > { %s480_s29 = scalar_lea.vmem %s479_s28, 256  ;;  %p481_p13 = scmp.lt.s32.totalorder %s603_s10, %s479_s28 }
  0x1c   : > { %p476_p6 = pnand %p474_p5, %p462_p12  ;;  %p482_p9 = scmp.lt.s32.totalorder %s480_s29, %s473_s24 }
  0x1e   : > { %p477_p11 = pneg %p476_p6  ;;  %p483_p10 = por %p482_p9, %p481_p13 }
  0x20   : > { %p484_p7 = pnand %p483_p10, %p477_p11 }
  0x22   : > { %487 = shalt.err (!%p484_p7)
}
  0x23   : > { %422 = dma.hbm_to_vmem [thread:$0]  (!%p605_p8), %s601_s8, 128, %s603_s10, %s190_s12  }
  0x24   : > { %p678_p0 = scmp.lt.s32.totalorder %s522_s21, 4  ;;  %p679_p1 = scmp.ge.s32.totalorder %s522_s21, 1 }
  0x26   : > { %p212_p12 = pnand %p679_p1, %p678_p0 }
  0x27   : > { %s217_s30 = sand.u32 (!%p212_p12), 1, %s514_s19   ;;  %p680_p9 = scmp.ne.s32.totalorder (!%p212_p12), %s676_s27, 0 }
  0x28   : > { %215 = sbr.rel (%p212_p12) target bundleno = 321 (0x141), region = 36  ;;  %s410_s6 = sshll.u32 (!%p212_p12), %s217_s30, 3 }
  0x29   : > { %s218_s7 = scalar_lea.sflag (!%p212_p12), [#allocation3], %s217_s30  ;;  %s221_s9 = scalar_lea.vmem (!%p212_p12), [#allocation2], %s410_s6 }
  0x2d   : > { %505 = dma.done.wait (%p680_p9), %s218_s7, 128  }
  0x2e   : > { %507 = vsyncadd (%p680_p9), %s218_s7, 4294967168  ;;  %v525_v0 = vmov 0   ;;  %v273_v1 = vld [vmem:[%s672_s3] sm:$0xff]  ;;  %v268_v5 = vlaneseq  ;;  %s413_s27 = sshll.u32 %s575_s22, 7  ;;  %p254_p7 = scmp.lt.s32.totalorder %s575_s22, 2  ;;  %vm294_vm4 = vcmask 7168  }
  0x2f   : > { %457 = vset.pattern.permute.xlu0 %v525_v0  ;;  %v282_v2 = vld [vmem:[%s671_s2] sm:$0xff]  ;;  %v271_v7 = vstv %s413_s27 }
  0x30   : > { %275 = vperm.xlu0 %457, %v273_v1   ;;  %v265_v3 = vld [vmem:[%s221_s9] sm:$0xff]  ;;  %v269_v6 = vand.u32 127, %v268_v5  ;;  %s686_s22 = smov (!%p254_p7, %s575_s22), 2 }
  0x31   : > { %v266_v4 = vmul.f32 1.442695, %v265_v3  ;;  %s256_s14 = scalar_lea.vmem %s670_s1, %s686_s22  ;;  %s411_s15 = sshll.u32 %s686_s22, 3 }
  0x32   : > { %v272_v8 = vadd.s32 %v271_v7, %v269_v6  ;;  %v414_v11 = vld [vmem:[%s256_s14] ss:$0 sm:$0xff]  ;;  %s260_s18 = scalar_lea.vmem %s673_s4, %s411_s15  ;;  %s264_s28 = scalar_lea.vmem %s674_s5, %s411_s15 }
  0x33   : > { %458 = vpow2.f32 %v266_v4 }
  0x34   : > { %288 = vperm.xlu0 %457, %v282_v2   ;;  %vm278_vm0 = vcmp.lt.s32.totalorder %v272_v8, 320 }
  0x40   : > { %v459_v10 = vpop.eup %458 }
  0xab   : > { %v276_v9 = vpop.permute.xlu0 %275 }
  0xac   : > { %vm277_vm1 = vcmp.ne.s32.totalorder %v272_v8, %v276_v9 }
  0xad   : > { %vm279_vm2 = vmand %vm277_vm1, %vm278_vm0 }
  0xae   : > { %v280_v13 = vsel %vm279_vm2, %v459_v10, 0.0 }
  0xaf   : > { %v289_v12 = vpop.permute.xlu0 %288 }
  0xb0   : > { %vm290_vm3 = vcmp.eq.s32.totalorder %v414_v11, %v289_v12 }
  0xb1   : > { %v291_v14 = vsel %vm290_vm3, %v280_v13, 0.0 }
  0xb2   : > { %292 = vadd.xlane.f32.xlu1 %v291_v14 }
  0xb6   : > { %296 = vadd.xlane.f32.xlu1 %v280_v13 }
 0x13b   : > { %v293_v15 = vpop.xlane.xlu1 %292 }
 0x13c   : > { %295 = vst.msk [vmem:[%s260_s18] sm:$0xff] %vm294_vm4, %v293_v15 }
 0x13f   : > { %v297_v16 = vpop.xlane.xlu1 %296 }
 0x140   : > { %298 = vst.msk [vmem:[%s264_s28] sm:$0xff] %vm294_vm4, %v297_v16 }
 0x141 PF: > { %p16_p8 = scmp.ge.s32.totalorder %s578_s23, 5   ;;  %s681_s18 = smov %s514_s19 }
 0x142   : > { %s682_s19 = smov %s518_s20  ;;  %s683_s20 = smov %s588_s26 }
 0x143   : > { %s684_s21 = smov %s578_s23  ;;  %18 = sbr.rel (!%p16_p8) target bundleno = 3 (0x3), region = 91 }
 0x148   :  { %332 = vsyncpa [#allocation3], 1 }
 0x149   :  { %334 = vsyncpa [#allocation3 + $0x1], 1 }

</bundles_post_ra>
